<compile_context>
chip_gen: v6e
topology: v6e:2x2x1
jax: 0.10.0
libtpu: 0.0.40
codegen_flags: <defaults>
</compile_context>

<pallas_src>
import functools

import jax
import jax.numpy as jnp
from jax.experimental import pallas as pl
from jax.experimental.pallas import tpu as pltpu


def _round_up(x, m):
    return ((x + m - 1) // m) * m


# ----------------------------------------------------------------------------
# Kernel 1: one-shot (tm, K) @ (K, N) + bias (+ optional ReLU).
# The weight / bias blocks cover the full arrays and their index_maps are
# constant, so they are DMA'd into VMEM once and stay resident while the grid
# sweeps the M tiles. bf16 operands, f32 accumulation and epilogue.
# ----------------------------------------------------------------------------
def _matmul_bias_act_kernel(x_ref, w_ref, b_ref, o_ref, *, relu):
    acc = jnp.dot(x_ref[...], w_ref[...], preferred_element_type=jnp.float32)
    acc = acc + b_ref[...]
    if relu:
        acc = jnp.maximum(acc, 0.0)
    o_ref[...] = acc.astype(o_ref.dtype)


def pallas_matmul_bias_act(x, w, b2d, *, relu, out_dtype, tm_max=256):
    """y = act(x @ w + b).  x: (M, K) bf16, w: (K, N) bf16, b2d: (1, N) f32."""
    M, K = x.shape
    Kw, N = w.shape
    assert K == Kw
    tm = min(tm_max, _round_up(max(M, 1), 16))
    grid = (pl.cdiv(M, tm),)  # partial edge blocks: OOB rows masked on write
    return pl.pallas_call(
        functools.partial(_matmul_bias_act_kernel, relu=relu),
        out_shape=jax.ShapeDtypeStruct((M, N), out_dtype),
        grid_spec=pltpu.PrefetchScalarGridSpec(
            num_scalar_prefetch=0,
            grid=grid,
            in_specs=[
                pl.BlockSpec((tm, K), lambda i: (i, 0)),
                pl.BlockSpec((K, N), lambda i: (0, 0)),   # weight resident
                pl.BlockSpec((1, N), lambda i: (0, 0)),   # bias resident
            ],
            out_specs=pl.BlockSpec((tm, N), lambda i: (i, 0)),
        ),
        compiler_params=pltpu.CompilerParams(
            dimension_semantics=("parallel",),
            vmem_limit_bytes=32 * 1024 * 1024,
        ),
    )(x, w, b2d)


# ----------------------------------------------------------------------------
# Kernel 2: fused fc1 (+ReLU) + fc_q.  Both weights stay resident in VMEM
# (fc1 weight is at most ~3.2 MB in bf16 for real Atari 84x84 inputs); the
# 512-wide hidden activation lives only in registers/VMEM, never in HBM.
# ----------------------------------------------------------------------------
def _fc_fused_kernel(x_ref, w1_ref, b1_ref, wq_ref, bq_ref, o_ref):
    h = jnp.dot(x_ref[...], w1_ref[...], preferred_element_type=jnp.float32)
    h = jnp.maximum(h + b1_ref[...], 0.0)
    q = jnp.dot(h.astype(jnp.bfloat16), wq_ref[...],
                preferred_element_type=jnp.float32)
    o_ref[...] = (q + bq_ref[...]).astype(o_ref.dtype)


def pallas_fc_fused(x, w1, b1, wq, bq, *, tm_max=256):
    M, K1 = x.shape
    K1w, H = w1.shape
    Hw, NQ = wq.shape
    assert K1 == K1w and H == Hw
    tm = min(tm_max, _round_up(max(M, 1), 16))
    grid = (pl.cdiv(M, tm),)
    return pl.pallas_call(
        _fc_fused_kernel,
        out_shape=jax.ShapeDtypeStruct((M, NQ), jnp.float32),
        grid_spec=pltpu.PrefetchScalarGridSpec(
            num_scalar_prefetch=0,
            grid=grid,
            in_specs=[
                pl.BlockSpec((tm, K1), lambda i: (i, 0)),
                pl.BlockSpec((K1, H), lambda i: (0, 0)),
                pl.BlockSpec((1, H), lambda i: (0, 0)),
                pl.BlockSpec((H, NQ), lambda i: (0, 0)),
                pl.BlockSpec((1, NQ), lambda i: (0, 0)),
            ],
            out_specs=pl.BlockSpec((tm, NQ), lambda i: (i, 0)),
        ),
        compiler_params=pltpu.CompilerParams(
            dimension_semantics=("parallel",),
            vmem_limit_bytes=32 * 1024 * 1024,
        ),
    )(x, w1, b1, wq, bq)


# ----------------------------------------------------------------------------
# im2col glue (plain JAX reshuffle in bf16; the conv arithmetic runs in Pallas).
# x is NHWC. Patch feature order is (kh, kw, C), matching the weight prep below.
# ----------------------------------------------------------------------------
def im2col(x, kh, kw, stride):
    # TODO(synk): fold im2col into the Pallas kernel (strided index_map /
    # in-kernel accumulation over kh*kw taps) to avoid materializing the
    # expanded patch matrix in HBM.
    n, h, w, c = x.shape
    oh = (h - kh) // stride + 1
    ow = (w - kw) // stride + 1
    patches = []
    for i in range(kh):
        for j in range(kw):
            patches.append(
                x[:, i : i + stride * (oh - 1) + 1 : stride,
                     j : j + stride * (ow - 1) + 1 : stride, :]
            )
    p = jnp.stack(patches, axis=3)            # (n, oh, ow, kh*kw, c)
    return p.reshape(n * oh * ow, kh * kw * c), oh, ow


def conv2d_pallas(x_nhwc, w_mat, b2d, kh, kw, stride, *, relu):
    """Conv2d (valid padding) via im2col + Pallas matmul. Returns NHWC bf16."""
    n = x_nhwc.shape[0]
    cols, oh, ow = im2col(x_nhwc, kh, kw, stride)
    y = pallas_matmul_bias_act(cols, w_mat, b2d, relu=relu,
                               out_dtype=jnp.bfloat16)
    return y.reshape(n, oh, ow, w_mat.shape[1])


# ----------------------------------------------------------------------------
# Parameter init (PyTorch layout): kaiming_normal_ (fan_in, gain=sqrt(2)), 0 bias.
# ----------------------------------------------------------------------------
def kaiming_normal(key, shape, fan_in):
    return jax.random.normal(key, shape, jnp.float32) * jnp.sqrt(2.0 / fan_in)


def conv_out_hw(h, w):
    h1, w1 = (h - 8) // 4 + 1, (w - 8) // 4 + 1
    h2, w2 = (h1 - 4) // 2 + 1, (w1 - 4) // 2 + 1
    return h2 - 3 + 1, w2 - 3 + 1


def init_params(key, in_channels, h, w, n_actions):
    k = jax.random.split(key, 5)
    h3, w3 = conv_out_hw(h, w)
    output_dim = 64 * h3 * w3
    return {
        "conv1_w": kaiming_normal(k[0], (32, in_channels, 8, 8), in_channels * 64),
        "conv1_b": jnp.zeros((32,), jnp.float32),
        "conv2_w": kaiming_normal(k[1], (64, 32, 4, 4), 32 * 16),
        "conv2_b": jnp.zeros((64,), jnp.float32),
        "conv3_w": kaiming_normal(k[2], (64, 64, 3, 3), 64 * 9),
        "conv3_b": jnp.zeros((64,), jnp.float32),
        "fc1_w": kaiming_normal(k[3], (512, output_dim), output_dim),
        "fc1_b": jnp.zeros((512,), jnp.float32),
        "fcq_w": kaiming_normal(k[4], (n_actions, 512), 512),
        "fcq_b": jnp.zeros((n_actions,), jnp.float32),
    }


def _prep_conv(w_oihw, b, scale=1.0):
    """(OC,IC,KH,KW) -> (KH*KW*IC, OC) bf16 matrix matching im2col order."""
    oc, ic, kh, kw = w_oihw.shape
    w_mat = jnp.transpose(w_oihw, (2, 3, 1, 0)).reshape(kh * kw * ic, oc) * scale
    return w_mat.astype(jnp.bfloat16), b.reshape(1, oc).astype(jnp.float32)


def prepare_params(params, h, w):
    """One-time reshapes/transposes/casts into kernel-ready layouts."""
    h3, w3 = conv_out_hw(h, w)
    prepared = {}
    # Fold the x/255 input scale into conv1's weights (bias untouched).
    prepared["c1_w"], prepared["c1_b"] = _prep_conv(
        params["conv1_w"], params["conv1_b"], scale=1.0 / 255.0)
    prepared["c2_w"], prepared["c2_b"] = _prep_conv(params["conv2_w"], params["conv2_b"])
    prepared["c3_w"], prepared["c3_b"] = _prep_conv(params["conv3_w"], params["conv3_b"])
    # fc1 expects PyTorch NCHW-flattened features; we feed NHWC-flattened ones,
    # so permute the weight columns (C,H,W) -> (H,W,C) once at init.
    fc1_w = params["fc1_w"].reshape(512, 64, h3, w3)
    fc1_w = jnp.transpose(fc1_w, (0, 2, 3, 1)).reshape(512, h3 * w3 * 64)
    prepared["fc1_w"] = fc1_w.T.astype(jnp.bfloat16)            # (K1, 512)
    prepared["fc1_b"] = params["fc1_b"].reshape(1, -1).astype(jnp.float32)
    prepared["fcq_w"] = params["fcq_w"].T.astype(jnp.bfloat16)  # (512, n_actions)
    prepared["fcq_b"] = params["fcq_b"].reshape(1, -1).astype(jnp.float32)
    return prepared


# ----------------------------------------------------------------------------
# Forward: q = fc_q(relu(fc1(relu(flatten(conv(x/255))))))
# ----------------------------------------------------------------------------
@jax.jit
def soft_q_forward(x_nchw, prepared):
    n = x_nchw.shape[0]
    # NCHW uint8 -> NHWC bf16 (exact for 0..255); the /255 is folded into conv1's weights.
    x = jnp.transpose(x_nchw, (0, 2, 3, 1)).astype(jnp.bfloat16)
    x = conv2d_pallas(x, prepared["c1_w"], prepared["c1_b"], 8, 8, 4, relu=True)
    x = conv2d_pallas(x, prepared["c2_w"], prepared["c2_b"], 4, 4, 2, relu=True)
    # Sequential ends with Flatten (no ReLU); the outer F.relu is elementwise,
    # so fusing it into conv3 before the flatten is equivalent.
    x = conv2d_pallas(x, prepared["c3_w"], prepared["c3_b"], 3, 3, 1, relu=True)
    feat = x.reshape(n, -1)  # NHWC flatten; fc1 weight rows were permuted to match.
    return pallas_fc_fused(feat, prepared["fc1_w"], prepared["fc1_b"],
                           prepared["fcq_w"], prepared["fcq_b"])


# ----------------------------------------------------------------------------
# Pure-JAX f32 reference (PyTorch semantics) for a sanity check.
# ----------------------------------------------------------------------------
def reference_forward(x_nchw, params):
    x = x_nchw.astype(jnp.float32) / 255.0

    def conv(x, w, b, s):
        y = jax.lax.conv_general_dilated(
            x, w, (s, s), "VALID", dimension_numbers=("NCHW", "OIHW", "NCHW"))
        return y + b.reshape(1, -1, 1, 1)

    x = jax.nn.relu(conv(x, params["conv1_w"], params["conv1_b"], 4))
    x = jax.nn.relu(conv(x, params["conv2_w"], params["conv2_b"], 2))
    x = conv(x, params["conv3_w"], params["conv3_b"], 1)
    x = jax.nn.relu(x.reshape(x.shape[0], -1))
    h = jax.nn.relu(x @ params["fc1_w"].T + params["fc1_b"])
    return h @ params["fcq_w"].T + params["fcq_b"]


if __name__ == "__main__":
    key = jax.random.PRNGKey(0)
    k_param, k_obs = jax.random.split(key)

    # Small Atari-like problem: batch=2, 4 stacked frames, 36x36 pixels, 6 actions.
    batch, channels, height, width, n_actions = 2, 4, 36, 36, 6

    params = init_params(k_param, channels, height, width, n_actions)
    prepared = prepare_params(params, height, width)
    obs = jax.random.randint(
        k_obs, (batch, channels, height, width), 0, 256, dtype=jnp.int32
    ).astype(jnp.uint8)

    q = soft_q_forward(obs, prepared)
    q = jax.block_until_ready(q)
    assert q.shape == (batch, n_actions), q.shape
    assert q.dtype == jnp.float32
    assert bool(jnp.all(jnp.isfinite(q)))

    # Loose check against the f32 reference (kernels run in bf16 w/ f32 accum).
    q_ref = reference_forward(obs, params)
    err = float(jnp.max(jnp.abs(q - q_ref)))
    tol = 0.15 * (1.0 + float(jnp.max(jnp.abs(q_ref))))
    assert err <= tol, (err, tol)

    print("KERNEL_OK")
</pallas_src>

<mosaic_0001>
module attributes {stable_mosaic.version = 11 : i64} {
  func.func @_matmul_bias_act_kernel(%arg0: i32, %arg1: memref<128x256xbf16, #tpu.memory_space<vmem>>, %arg2: memref<256x32xbf16, #tpu.memory_space<vmem>>, %arg3: memref<1x32xf32, #tpu.memory_space<vmem>>, %arg4: memref<128x32xbf16, #tpu.memory_space<vmem>>) attributes {dimension_semantics = [#tpu.dimension_semantics<parallel>], iteration_bounds = array<i64: 1>, scalar_prefetch = 0 : i64, scratch_operands = 0 : i64, tpu.core_type = #tpu.core_type<tc>, window_params = [{transform_indices = @transform_0, window_bounds = array<i64: 128, 256>}, {pipeline_mode = #tpu.pipeline_mode<synchronous>, transform_indices = @transform_1, window_bounds = array<i64: 256, 32>}, {pipeline_mode = #tpu.pipeline_mode<synchronous>, transform_indices = @transform_2, window_bounds = array<i64: 1, 32>}, {transform_indices = @transform_3, window_bounds = array<i64: 128, 32>}]} {
    %c0 = arith.constant 0 : index
    %c0_0 = arith.constant 0 : index
    %0 = vector.load %arg1[%c0, %c0_0] : memref<128x256xbf16, #tpu.memory_space<vmem>>, vector<128x256xbf16>
    %c0_1 = arith.constant 0 : index
    %c0_2 = arith.constant 0 : index
    %1 = vector.load %arg2[%c0_1, %c0_2] : memref<256x32xbf16, #tpu.memory_space<vmem>>, vector<256x32xbf16>
    %cst = arith.constant dense<0.000000e+00> : vector<128x32xf32>
    %2 = tpu.matmul %0, %1, %cst {dimension_numbers = #tpu.dot_dimension_numbers<[1], [0], [0], [1], [0, 0, 1, 1], [], []>} : vector<128x256xbf16>, vector<256x32xbf16>, vector<128x32xf32> -> vector<128x32xf32>
    %c0_3 = arith.constant 0 : index
    %c0_4 = arith.constant 0 : index
    %3 = vector.load %arg3[%c0_3, %c0_4] : memref<1x32xf32, #tpu.memory_space<vmem>>, vector<1x32xf32>
    %4 = vector.broadcast %3 : vector<1x32xf32> to vector<128x32xf32>
    %5 = arith.addf %2, %4 : vector<128x32xf32>
    %cst_5 = arith.constant 0.000000e+00 : f32
    %6 = vector.broadcast %cst_5 : f32 to vector<128x32xf32>
    %7 = arith.maximumf %5, %6 : vector<128x32xf32>
    %8 = arith.truncf %7 : vector<128x32xf32> to vector<128x32xbf16>
    %c0_6 = arith.constant 0 : index
    %c0_7 = arith.constant 0 : index
    %9 = vector.load %arg4[%c0_6, %c0_7] : memref<128x32xbf16, #tpu.memory_space<vmem>>, vector<128x32xbf16>
    tpu.vector_store %arg4[%c0_6, %c0_7], %8 {strides = array<i32>} : memref<128x32xbf16, #tpu.memory_space<vmem>>, vector<128x32xbf16>,
    return
  }
  func.func @transform_0(%arg0: i32) -> (i32, i32) {
    %c0_i32 = arith.constant 0 : i32
    %c0_i32_0 = arith.constant 0 : i32
    return %arg0, %c0_i32 : i32, i32
  }
  func.func @transform_1(%arg0: i32) -> (i32, i32) {
    %c0_i32 = arith.constant 0 : i32
    %c0_i32_0 = arith.constant 0 : i32
    %c0_i32_1 = arith.constant 0 : i32
    return %c0_i32, %c0_i32_0 : i32, i32
  }
  func.func @transform_2(%arg0: i32) -> (i32, i32) {
    %c0_i32 = arith.constant 0 : i32
    %c0_i32_0 = arith.constant 0 : i32
    %c0_i32_1 = arith.constant 0 : i32
    return %c0_i32, %c0_i32_0 : i32, i32
  }
  func.func @transform_3(%arg0: i32) -> (i32, i32) {
    %c0_i32 = arith.constant 0 : i32
    %c0_i32_0 = arith.constant 0 : i32
    return %arg0, %c0_i32 : i32, i32
  }
}

module attributes {stable_mosaic.version = 11 : i64} {
  func.func @_matmul_bias_act_kernel(%arg0: i32, %arg1: memref<32x512xbf16, #tpu.memory_space<vmem>>, %arg2: memref<512x64xbf16, #tpu.memory_space<vmem>>, %arg3: memref<1x64xf32, #tpu.memory_space<vmem>>, %arg4: memref<32x64xbf16, #tpu.memory_space<vmem>>) attributes {dimension_semantics = [#tpu.dimension_semantics<parallel>], iteration_bounds = array<i64: 1>, scalar_prefetch = 0 : i64, scratch_operands = 0 : i64, tpu.core_type = #tpu.core_type<tc>, window_params = [{transform_indices = @transform_0, window_bounds = array<i64: 32, 512>}, {pipeline_mode = #tpu.pipeline_mode<synchronous>, transform_indices = @transform_1, window_bounds = array<i64: 512, 64>}, {pipeline_mode = #tpu.pipeline_mode<synchronous>, transform_indices = @transform_2, window_bounds = array<i64: 1, 64>}, {transform_indices = @transform_3, window_bounds = array<i64: 32, 64>}]} {
    %c0 = arith.constant 0 : index
    %c0_0 = arith.constant 0 : index
    %0 = vector.load %arg1[%c0, %c0_0] : memref<32x512xbf16, #tpu.memory_space<vmem>>, vector<32x512xbf16>
    %c0_1 = arith.constant 0 : index
    %c0_2 = arith.constant 0 : index
    %1 = vector.load %arg2[%c0_1, %c0_2] : memref<512x64xbf16, #tpu.memory_space<vmem>>, vector<512x64xbf16>
    %cst = arith.constant dense<0.000000e+00> : vector<32x64xf32>
    %2 = tpu.matmul %0, %1, %cst {dimension_numbers = #tpu.dot_dimension_numbers<[1], [0], [0], [1], [0, 0, 1, 1], [], []>} : vector<32x512xbf16>, vector<512x64xbf16>, vector<32x64xf32> -> vector<32x64xf32>
    %c0_3 = arith.constant 0 : index
    %c0_4 = arith.constant 0 : index
    %3 = vector.load %arg3[%c0_3, %c0_4] : memref<1x64xf32, #tpu.memory_space<vmem>>, vector<1x64xf32>
    %4 = vector.broadcast %3 : vector<1x64xf32> to vector<32x64xf32>
    %5 = arith.addf %2, %4 : vector<32x64xf32>
    %cst_5 = arith.constant 0.000000e+00 : f32
    %6 = vector.broadcast %cst_5 : f32 to vector<32x64xf32>
    %7 = arith.maximumf %5, %6 : vector<32x64xf32>
    %8 = arith.truncf %7 : vector<32x64xf32> to vector<32x64xbf16>
    %c0_6 = arith.constant 0 : index
    %c0_7 = arith.constant 0 : index
    %9 = vector.load %arg4[%c0_6, %c0_7] : memref<32x64xbf16, #tpu.memory_space<vmem>>, vector<32x64xbf16>
    tpu.vector_store %arg4[%c0_6, %c0_7], %8 {strides = array<i32>} : memref<32x64xbf16, #tpu.memory_space<vmem>>, vector<32x64xbf16>,
    return
  }
  func.func @transform_0(%arg0: i32) -> (i32, i32) {
    %c0_i32 = arith.constant 0 : i32
    %c0_i32_0 = arith.constant 0 : i32
    return %arg0, %c0_i32 : i32, i32
  }
  func.func @transform_1(%arg0: i32) -> (i32, i32) {
    %c0_i32 = arith.constant 0 : i32
    %c0_i32_0 = arith.constant 0 : i32
    %c0_i32_1 = arith.constant 0 : i32
    return %c0_i32, %c0_i32_0 : i32, i32
  }
  func.func @transform_2(%arg0: i32) -> (i32, i32) {
    %c0_i32 = arith.constant 0 : i32
    %c0_i32_0 = arith.constant 0 : i32
    %c0_i32_1 = arith.constant 0 : i32
    return %c0_i32, %c0_i32_0 : i32, i32
  }
  func.func @transform_3(%arg0: i32) -> (i32, i32) {
    %c0_i32 = arith.constant 0 : i32
    %c0_i32_0 = arith.constant 0 : i32
    return %arg0, %c0_i32 : i32, i32
  }
}

module attributes {stable_mosaic.version = 11 : i64} {
  func.func @_matmul_bias_act_kernel(%arg0: i32, %arg1: memref<16x576xbf16, #tpu.memory_space<vmem>>, %arg2: memref<576x64xbf16, #tpu.memory_space<vmem>>, %arg3: memref<1x64xf32, #tpu.memory_space<vmem>>, %arg4: memref<16x64xbf16, #tpu.memory_space<vmem>>) attributes {dimension_semantics = [#tpu.dimension_semantics<parallel>], iteration_bounds = array<i64: 1>, scalar_prefetch = 0 : i64, scratch_operands = 0 : i64, tpu.core_type = #tpu.core_type<tc>, window_params = [{transform_indices = @transform_0, window_bounds = array<i64: 16, 576>}, {pipeline_mode = #tpu.pipeline_mode<synchronous>, transform_indices = @transform_1, window_bounds = array<i64: 576, 64>}, {pipeline_mode = #tpu.pipeline_mode<synchronous>, transform_indices = @transform_2, window_bounds = array<i64: 1, 64>}, {transform_indices = @transform_3, window_bounds = array<i64: 16, 64>}]} {
    %c0 = arith.constant 0 : index
    %c0_0 = arith.constant 0 : index
    %0 = vector.load %arg1[%c0, %c0_0] : memref<16x576xbf16, #tpu.memory_space<vmem>>, vector<16x576xbf16>
    %c0_1 = arith.constant 0 : index
    %c0_2 = arith.constant 0 : index
    %1 = vector.load %arg2[%c0_1, %c0_2] : memref<576x64xbf16, #tpu.memory_space<vmem>>, vector<576x64xbf16>
    %cst = arith.constant dense<0.000000e+00> : vector<16x64xf32>
    %2 = tpu.matmul %0, %1, %cst {dimension_numbers = #tpu.dot_dimension_numbers<[1], [0], [0], [1], [0, 0, 1, 1], [], []>} : vector<16x576xbf16>, vector<576x64xbf16>, vector<16x64xf32> -> vector<16x64xf32>
    %c0_3 = arith.constant 0 : index
    %c0_4 = arith.constant 0 : index
    %3 = vector.load %arg3[%c0_3, %c0_4] : memref<1x64xf32, #tpu.memory_space<vmem>>, vector<1x64xf32>
    %4 = vector.broadcast %3 : vector<1x64xf32> to vector<16x64xf32>
    %5 = arith.addf %2, %4 : vector<16x64xf32>
    %cst_5 = arith.constant 0.000000e+00 : f32
    %6 = vector.broadcast %cst_5 : f32 to vector<16x64xf32>
    %7 = arith.maximumf %5, %6 : vector<16x64xf32>
    %8 = arith.truncf %7 : vector<16x64xf32> to vector<16x64xbf16>
    %c0_6 = arith.constant 0 : index
    %c0_7 = arith.constant 0 : index
    %9 = vector.load %arg4[%c0_6, %c0_7] : memref<16x64xbf16, #tpu.memory_space<vmem>>, vector<16x64xbf16>
    tpu.vector_store %arg4[%c0_6, %c0_7], %8 {strides = array<i32>} : memref<16x64xbf16, #tpu.memory_space<vmem>>, vector<16x64xbf16>,
    return
  }
  func.func @transform_0(%arg0: i32) -> (i32, i32) {
    %c0_i32 = arith.constant 0 : i32
    %c0_i32_0 = arith.constant 0 : i32
    return %arg0, %c0_i32 : i32, i32
  }
  func.func @transform_1(%arg0: i32) -> (i32, i32) {
    %c0_i32 = arith.constant 0 : i32
    %c0_i32_0 = arith.constant 0 : i32
    %c0_i32_1 = arith.constant 0 : i32
    return %c0_i32, %c0_i32_0 : i32, i32
  }
  func.func @transform_2(%arg0: i32) -> (i32, i32) {
    %c0_i32 = arith.constant 0 : i32
    %c0_i32_0 = arith.constant 0 : i32
    %c0_i32_1 = arith.constant 0 : i32
    return %c0_i32, %c0_i32_0 : i32, i32
  }
  func.func @transform_3(%arg0: i32) -> (i32, i32) {
    %c0_i32 = arith.constant 0 : i32
    %c0_i32_0 = arith.constant 0 : i32
    return %arg0, %c0_i32 : i32, i32
  }
}

module attributes {stable_mosaic.version = 11 : i64} {
  func.func @_fc_fused_kernel(%arg0: i32, %arg1: memref<16x64xbf16, #tpu.memory_space<vmem>>, %arg2: memref<64x512xbf16, #tpu.memory_space<vmem>>, %arg3: memref<1x512xf32, #tpu.memory_space<vmem>>, %arg4: memref<512x6xbf16, #tpu.memory_space<vmem>>, %arg5: memref<1x6xf32, #tpu.memory_space<vmem>>, %arg6: memref<16x6xf32, #tpu.memory_space<vmem>>) attributes {dimension_semantics = [#tpu.dimension_semantics<parallel>], iteration_bounds = array<i64: 1>, scalar_prefetch = 0 : i64, scratch_operands = 0 : i64, tpu.core_type = #tpu.core_type<tc>, window_params = [{transform_indices = @transform_0, window_bounds = array<i64: 16, 64>}, {pipeline_mode = #tpu.pipeline_mode<synchronous>, transform_indices = @transform_1, window_bounds = array<i64: 64, 512>}, {pipeline_mode = #tpu.pipeline_mode<synchronous>, transform_indices = @transform_2, window_bounds = array<i64: 1, 512>}, {pipeline_mode = #tpu.pipeline_mode<synchronous>, transform_indices = @transform_3, window_bounds = array<i64: 512, 6>}, {pipeline_mode = #tpu.pipeline_mode<synchronous>, transform_indices = @transform_4, window_bounds = array<i64: 1, 6>}, {transform_indices = @transform_5, window_bounds = array<i64: 16, 6>}]} {
    %c0 = arith.constant 0 : index
    %c0_0 = arith.constant 0 : index
    %0 = vector.load %arg1[%c0, %c0_0] : memref<16x64xbf16, #tpu.memory_space<vmem>>, vector<16x64xbf16>
    %c0_1 = arith.constant 0 : index
    %c0_2 = arith.constant 0 : index
    %1 = vector.load %arg2[%c0_1, %c0_2] : memref<64x512xbf16, #tpu.memory_space<vmem>>, vector<64x512xbf16>
    %cst = arith.constant dense<0.000000e+00> : vector<16x512xf32>
    %2 = tpu.matmul %0, %1, %cst {dimension_numbers = #tpu.dot_dimension_numbers<[1], [0], [0], [1], [0, 0, 1, 1], [], []>} : vector<16x64xbf16>, vector<64x512xbf16>, vector<16x512xf32> -> vector<16x512xf32>
    %c0_3 = arith.constant 0 : index
    %c0_4 = arith.constant 0 : index
    %3 = vector.load %arg3[%c0_3, %c0_4] : memref<1x512xf32, #tpu.memory_space<vmem>>, vector<1x512xf32>
    %4 = vector.broadcast %3 : vector<1x512xf32> to vector<16x512xf32>
    %5 = arith.addf %2, %4 : vector<16x512xf32>
    %cst_5 = arith.constant 0.000000e+00 : f32
    %6 = vector.broadcast %cst_5 : f32 to vector<16x512xf32>
    %7 = arith.maximumf %5, %6 : vector<16x512xf32>
    %8 = arith.truncf %7 : vector<16x512xf32> to vector<16x512xbf16>
    %c0_6 = arith.constant 0 : index
    %c0_7 = arith.constant 0 : index
    %9 = vector.load %arg4[%c0_6, %c0_7] : memref<512x6xbf16, #tpu.memory_space<vmem>>, vector<512x6xbf16>
    %cst_8 = arith.constant dense<0.000000e+00> : vector<16x6xf32>
    %10 = tpu.matmul %8, %9, %cst_8 {dimension_numbers = #tpu.dot_dimension_numbers<[1], [0], [0], [1], [0, 0, 1, 1], [], []>} : vector<16x512xbf16>, vector<512x6xbf16>, vector<16x6xf32> -> vector<16x6xf32>
    %c0_9 = arith.constant 0 : index
    %c0_10 = arith.constant 0 : index
    %11 = vector.load %arg5[%c0_9, %c0_10] : memref<1x6xf32, #tpu.memory_space<vmem>>, vector<1x6xf32>
    %12 = vector.broadcast %11 : vector<1x6xf32> to vector<16x6xf32>
    %13 = arith.addf %10, %12 : vector<16x6xf32>
    %c0_11 = arith.constant 0 : index
    %c0_12 = arith.constant 0 : index
    %14 = vector.load %arg6[%c0_11, %c0_12] : memref<16x6xf32, #tpu.memory_space<vmem>>, vector<16x6xf32>
    tpu.vector_store %arg6[%c0_11, %c0_12], %13 {strides = array<i32>} : memref<16x6xf32, #tpu.memory_space<vmem>>, vector<16x6xf32>,
    return
  }
  func.func @transform_0(%arg0: i32) -> (i32, i32) {
    %c0_i32 = arith.constant 0 : i32
    %c0_i32_0 = arith.constant 0 : i32
    return %arg0, %c0_i32 : i32, i32
  }
  func.func @transform_1(%arg0: i32) -> (i32, i32) {
    %c0_i32 = arith.constant 0 : i32
    %c0_i32_0 = arith.constant 0 : i32
    %c0_i32_1 = arith.constant 0 : i32
    return %c0_i32, %c0_i32_0 : i32, i32
  }
  func.func @transform_2(%arg0: i32) -> (i32, i32) {
    %c0_i32 = arith.constant 0 : i32
    %c0_i32_0 = arith.constant 0 : i32
    %c0_i32_1 = arith.constant 0 : i32
    return %c0_i32, %c0_i32_0 : i32, i32
  }
  func.func @transform_3(%arg0: i32) -> (i32, i32) {
    %c0_i32 = arith.constant 0 : i32
    %c0_i32_0 = arith.constant 0 : i32
    %c0_i32_1 = arith.constant 0 : i32
    return %c0_i32, %c0_i32_0 : i32, i32
  }
  func.func @transform_4(%arg0: i32) -> (i32, i32) {
    %c0_i32 = arith.constant 0 : i32
    %c0_i32_0 = arith.constant 0 : i32
    %c0_i32_1 = arith.constant 0 : i32
    return %c0_i32, %c0_i32_0 : i32, i32
  }
  func.func @transform_5(%arg0: i32) -> (i32, i32) {
    %c0_i32 = arith.constant 0 : i32
    %c0_i32_0 = arith.constant 0 : i32
    return %arg0, %c0_i32 : i32, i32
  }
}

</mosaic_0001>

<bundles_post_ra>
// kernel: soft_q_forward.4
= control target key start
LH: loop header
LB: loop body
LE: loop exit
PB: predicated region body
PF: predicated region fallthrough
CT: control target
= control target key end

     0   :  { %vm423_vm0 = vcmask 257024   ;;  %s830_s1 = inlined_call_operand.vmem [shape: bf16[256,32], index: 1, kind: input, shape index: {}]   ;;  %s831_s0 = inlined_call_operand.vmem [shape: bf16[128,256], index: 0, kind: input, shape index: {}]   ;;  %s832_s2 = inlined_call_operand.vmem [shape: f32[1,32], index: 2, kind: input, shape index: {}]   ;;  %s833_s3 = inlined_call_operand.vmem [shape: bf16[128,32], index: 3, kind: output, shape index: {}]  }
   0x1   :  { %v589_v0 = vld [vmem:[%s830_s1 + $0x78] sm:$0xff]   ;;  %v591_v2 = vld [vmem:[%s830_s1 + $0x70] sm:$0xff]   ;;  %v593_v4 = vld [vmem:[%s830_s1 + $0x68] sm:$0xff]  }
   0x2   :  { %v590_v1 = vld [vmem:[%s830_s1 + $0x38] sm:$0xff]   ;;  %509 = vmatprep.subr.bf16.mxu0 %v589_v0  ;;  %573 = vmatprep.subr.bf16.mxu1 %v589_v0  ;;  %v592_v3 = vld [vmem:[%s830_s1 + $0x30] sm:$0xff]   ;;  %v594_v5 = vld [vmem:[%s830_s1 + $0x28] sm:$0xff]  }
   0x3   :  { %510 = vmatpush3.bf16.msra.mxu0 %v590_v1  ;;  %581 = vmatpush3.bf16.msra.mxu1 %v590_v1  ;;  %v595_v6 = vld [vmem:[%s830_s1 + $0x60] sm:$0xff]   ;;  %v597_v8 = vld [vmem:[%s830_s1 + $0x58] sm:$0xff]   ;;  %v599_v10 = vld [vmem:[%s830_s1 + $0x50] sm:$0xff]  }
   0x4   :  { %511 = vmatprep.subr.bf16.mxu0 %v591_v2  ;;  %574 = vmatprep.subr.bf16.mxu1 %v591_v2  ;;  %v596_v7 = vld [vmem:[%s830_s1 + $0x20] sm:$0xff]   ;;  %v598_v9 = vld [vmem:[%s830_s1 + $0x18] sm:$0xff]   ;;  %v600_v13 = vld [vmem:[%s830_s1 + $0x10] sm:$0xff]  }
   0x5   :  { %v607_v11 = vld [vmem:[%s831_s0 + $0x4] ss:$8 sps:$4 sm:$0xff]   ;;  %v605_v18 = vld [vmem:[%s831_s0] ss:$8 sps:$4 sm:$0xff]   ;;  %v611_v20 = vld [vmem:[%s831_s0 + $0x14] ss:$8 sps:$4 sm:$0xff]  }
   0x6   :  { %v610_v12 = vld [vmem:[%s831_s0 + $0x44] ss:$8 sps:$4 sm:$0xff]   ;;  %278 = vmatprep.mubr.bf16.mxu0 %v607_v11  ;;  %v608_v19 = vld [vmem:[%s831_s0 + $0x40] ss:$8 sps:$4 sm:$0xff]   ;;  %v613_v21 = vld [vmem:[%s831_s0 + $0x54] ss:$8 sps:$4 sm:$0xff]  }
   0x7   :  { %512 = vmatpush3.bf16.msra.mxu0 %v592_v3  ;;  %582 = vmatpush3.bf16.msra.mxu1 %v592_v3  ;;  %v601_v14 = vld [vmem:[%s830_s1 + $0x48] sm:$0xff]   ;;  %v603_v16 = vld [vmem:[%s830_s1 + $0x40] sm:$0xff]   ;;  %v615_v22 = vld [vmem:[%s831_s0 + $0x10] ss:$8 sps:$4 sm:$0xff]  }
   0x8   :  { %513 = vmatprep.subr.bf16.mxu0 %v593_v4  ;;  %575 = vmatprep.subr.bf16.mxu1 %v593_v4  ;;  %v602_v15 = vld [vmem:[%s830_s1 + $0x8] sm:$0xff]   ;;  %v604_v17 = vld [vmem:[%s830_s1] sm:$0xff]   ;;  %v616_v23 = vld [vmem:[%s831_s0 + $0x50] ss:$8 sps:$4 sm:$0xff]  }
   0x9   :  { %310 = vmatprep.mubr.bf16.mxu1 %v610_v12  ;;  %v617_v24 = vld [vmem:[%s831_s0 + $0x24] ss:$8 sps:$4 sm:$0xff]   ;;  %v621_v26 = vld [vmem:[%s831_s0 + $0x20] ss:$8 sps:$4 sm:$0xff]   ;;  %v623_v28 = vld [vmem:[%s831_s0 + $0x34] ss:$8 sps:$4 sm:$0xff]  }
   0xa   :  { %v619_v25 = vld [vmem:[%s831_s0 + $0x64] ss:$8 sps:$4 sm:$0xff]   ;;  %v622_v27 = vld [vmem:[%s831_s0 + $0x60] ss:$8 sps:$4 sm:$0xff]   ;;  %v625_v29 = vld [vmem:[%s831_s0 + $0x74] ss:$8 sps:$4 sm:$0xff]  }
   0xb   :  { %514 = vmatpush3.bf16.msra.mxu0 %v594_v5  ;;  %583 = vmatpush3.bf16.msra.mxu1 %v594_v5  ;;  %v627_v30 = vld [vmem:[%s831_s0 + $0x30] ss:$8 sps:$4 sm:$0xff]   ;;  %v748_v34 = vld [vmem:[%s832_s2] ss:$0 sm:$0xff] }
   0xc   :  { %515 = vmatprep.subr.bf16.mxu0 %v595_v6  ;;  %576 = vmatprep.subr.bf16.mxu1 %v595_v6  ;;  %v628_v31 = vld [vmem:[%s831_s0 + $0x70] ss:$8 sps:$4 sm:$0xff]  }
   0xf   :  { %516 = vmatpush3.bf16.msra.mxu0 %v596_v7  ;;  %584 = vmatpush3.bf16.msra.mxu1 %v596_v7 }
  0x10   :  { %517 = vmatprep.subr.bf16.mxu0 %v597_v8  ;;  %577 = vmatprep.subr.bf16.mxu1 %v597_v8 }
  0x13   :  { %518 = vmatpush3.bf16.msra.mxu0 %v598_v9  ;;  %585 = vmatpush3.bf16.msra.mxu1 %v598_v9 }
  0x14   :  { %519 = vmatprep.subr.bf16.mxu0 %v599_v10  ;;  %578 = vmatprep.subr.bf16.mxu1 %v599_v10 }
  0x17   :  { %520 = vmatpush3.bf16.msra.mxu0 %v600_v13  ;;  %586 = vmatpush3.bf16.msra.mxu1 %v600_v13 }
  0x18   :  { %521 = vmatprep.subr.bf16.mxu0 %v601_v14  ;;  %579 = vmatprep.subr.bf16.mxu1 %v601_v14 }
  0x1b   :  { %522 = vmatpush3.bf16.msra.mxu0 %v602_v15  ;;  %587 = vmatpush3.bf16.msra.mxu1 %v602_v15 }
  0x1c   :  { %523 = vmatprep.subr.bf16.mxu0 %v603_v16  ;;  %580 = vmatprep.subr.bf16.mxu1 %v603_v16 }
  0x1f   :  { %524 = vmatpush3.bf16.msra.mxu0 %v604_v17  ;;  %588 = vmatpush3.bf16.msra.mxu1 %v604_v17 }
  0x22   :  { %279 = vmatmul.mubr.bf16.vlgmr.msra.gmra.mxu0 %v605_v18  ;;  %311 = vmatmul.mubr.bf16.vlgmr.msra.gmra.mxu1 %v608_v19 }
  0x23   :  { %286 = vmatprep.mubr.bf16.mxu0 %v611_v20  ;;  %318 = vmatprep.mubr.bf16.mxu1 %v613_v21 }
  0x2a   :  { %287 = vmatmul.mubr.bf16.gmra.mxu0 %v615_v22  ;;  %319 = vmatmul.mubr.bf16.gmra.mxu1 %v616_v23 }
  0x2b   :  { %294 = vmatprep.mubr.bf16.mxu0 %v617_v24  ;;  %326 = vmatprep.mubr.bf16.mxu1 %v619_v25 }
  0x32   :  { %295 = vmatmul.mubr.bf16.gmra.mxu0 %v621_v26  ;;  %327 = vmatmul.mubr.bf16.gmra.mxu1 %v622_v27 }
  0x33   :  { %302 = vmatprep.mubr.bf16.mxu0 %v623_v28  ;;  %334 = vmatprep.mubr.bf16.mxu1 %v625_v29 }
  0x3a   :  { %303 = vmatmul.mubr.bf16.gmra.mxu0 %v627_v30  ;;  %335 = vmatmul.mubr.bf16.gmra.mxu1 %v628_v31 }
  0xe2   :  { %v525_v32 = vpop.f32.mrf.mxu0  ;;  %v549_v33 = vpop.f32.mrf.mxu1 }
  0xe4   :  { %v526_v35 = vpop.f32.mrf.mxu0  ;;  %v550_v36 = vpop.f32.mrf.mxu1 }
  0xe5   :  { %v527_v37 = vadd.f32 %v526_v35, %v525_v32  ;;  %v551_v38 = vadd.f32 %v550_v36, %v549_v33 }
  0xe6   :  { %v528_v39 = vpop.f32.mrf.mxu0  ;;  %v552_v40 = vpop.f32.mrf.mxu1 }
  0xe7   :  { %v281_v41 = vadd.f32 %v527_v37, %v748_v34  ;;  %v313_v42 = vadd.f32 %v551_v38, %v748_v34 }
  0xe8   :  { %v529_v43 = vpop.f32.mrf.mxu0  ;;  %v553_v44 = vpop.f32.mrf.mxu1 }
  0xe9   :  { %v343_v45 = vmax.f32 %v281_v41, 0.0  ;;  %v351_v46 = vmax.f32 %v313_v42, 0.0  ;;  %v530_v47 = vadd.f32 %v529_v43, %v528_v39  ;;  %v554_v48 = vadd.f32 %v553_v44, %v552_v40 }
  0xea   :  { %v531_v49 = vpop.f32.mrf.mxu0  ;;  %v555_v50 = vpop.f32.mrf.mxu1 }
  0xeb   :  { %v493_v51 = vpack.c.bf16 %v343_v45, %v343_v45  ;;  %v501_v52 = vpack.c.bf16 %v351_v46, %v351_v46  ;;  %v284_v53 = vadd.f32 %v530_v47, %v748_v34  ;;  %v316_v54 = vadd.f32 %v554_v48, %v748_v34 }
  0xec   :  { %v532_v55 = vpop.f32.mrf.mxu0  ;;  %v556_v56 = vpop.f32.mrf.mxu1 }
  0xed   :  { %424 = vst.msk [vmem:[%s833_s3] sm:$0xf] %vm423_vm0, %v493_v51  ;;  %432 = vst.msk [vmem:[%s833_s3 + $0x20] sm:$0xf] %vm423_vm0, %v501_v52  ;;  %v344_v57 = vmax.f32 %v284_v53, 0.0  ;;  %v352_v58 = vmax.f32 %v316_v54, 0.0  ;;  %v533_v59 = vadd.f32 %v532_v55, %v531_v49  ;;  %v557_v60 = vadd.f32 %v556_v56, %v555_v50 }
  0xee   :  { %v534_v61 = vpop.f32.mrf.mxu0  ;;  %v558_v62 = vpop.f32.mrf.mxu1 }
  0xef   :  { %v494_v63 = vpack.c.bf16 %v344_v57, %v344_v57  ;;  %v502_v0 = vpack.c.bf16 %v352_v58, %v352_v58  ;;  %v289_v1 = vadd.f32 %v533_v59, %v748_v34  ;;  %v321_v2 = vadd.f32 %v557_v60, %v748_v34 }
  0xf0   :  { %v535_v3 = vpop.f32.mrf.mxu0  ;;  %v559_v4 = vpop.f32.mrf.mxu1 }
  0xf1   :  { %425 = vst.msk [vmem:[%s833_s3 + $0x4] sm:$0xf] %vm423_vm0, %v494_v63  ;;  %433 = vst.msk [vmem:[%s833_s3 + $0x24] sm:$0xf] %vm423_vm0, %v502_v0  ;;  %v345_v5 = vmax.f32 %v289_v1, 0.0  ;;  %v353_v6 = vmax.f32 %v321_v2, 0.0  ;;  %v536_v7 = vadd.f32 %v535_v3, %v534_v61  ;;  %v560_v8 = vadd.f32 %v559_v4, %v558_v62 }
  0xf2   :  { %v537_v9 = vpop.f32.mrf.mxu0  ;;  %v561_v10 = vpop.f32.mrf.mxu1 }
  0xf3   :  { %v495_v11 = vpack.c.bf16 %v345_v5, %v345_v5  ;;  %v503_v12 = vpack.c.bf16 %v353_v6, %v353_v6  ;;  %v292_v13 = vadd.f32 %v536_v7, %v748_v34  ;;  %v324_v14 = vadd.f32 %v560_v8, %v748_v34 }
  0xf4   :  { %v538_v15 = vpop.f32.mrf.mxu0  ;;  %v562_v16 = vpop.f32.mrf.mxu1 }
  0xf5   :  { %426 = vst.msk [vmem:[%s833_s3 + $0x8] sm:$0xf] %vm423_vm0, %v495_v11  ;;  %434 = vst.msk [vmem:[%s833_s3 + $0x28] sm:$0xf] %vm423_vm0, %v503_v12  ;;  %v346_v17 = vmax.f32 %v292_v13, 0.0  ;;  %v354_v18 = vmax.f32 %v324_v14, 0.0  ;;  %v539_v19 = vadd.f32 %v538_v15, %v537_v9  ;;  %v563_v20 = vadd.f32 %v562_v16, %v561_v10 }
  0xf6   :  { %v540_v21 = vpop.f32.mrf.mxu0  ;;  %v564_v22 = vpop.f32.mrf.mxu1 }
  0xf7   :  { %v496_v23 = vpack.c.bf16 %v346_v17, %v346_v17  ;;  %v504_v24 = vpack.c.bf16 %v354_v18, %v354_v18  ;;  %v297_v25 = vadd.f32 %v539_v19, %v748_v34  ;;  %v329_v26 = vadd.f32 %v563_v20, %v748_v34 }
  0xf8   :  { %v541_v27 = vpop.f32.mrf.mxu0  ;;  %v565_v28 = vpop.f32.mrf.mxu1 }
  0xf9   :  { %427 = vst.msk [vmem:[%s833_s3 + $0xc] sm:$0xf] %vm423_vm0, %v496_v23  ;;  %435 = vst.msk [vmem:[%s833_s3 + $0x2c] sm:$0xf] %vm423_vm0, %v504_v24  ;;  %v347_v29 = vmax.f32 %v297_v25, 0.0  ;;  %v355_v30 = vmax.f32 %v329_v26, 0.0  ;;  %v542_v31 = vadd.f32 %v541_v27, %v540_v21  ;;  %v566_v32 = vadd.f32 %v565_v28, %v564_v22 }
  0xfa   :  { %v543_v33 = vpop.f32.mrf.mxu0  ;;  %v567_v35 = vpop.f32.mrf.mxu1 }
  0xfb   :  { %v497_v36 = vpack.c.bf16 %v347_v29, %v347_v29  ;;  %v505_v37 = vpack.c.bf16 %v355_v30, %v355_v30  ;;  %v300_v38 = vadd.f32 %v542_v31, %v748_v34  ;;  %v332_v39 = vadd.f32 %v566_v32, %v748_v34 }
  0xfc   :  { %v544_v40 = vpop.f32.mrf.mxu0  ;;  %v568_v41 = vpop.f32.mrf.mxu1 }
  0xfd   :  { %428 = vst.msk [vmem:[%s833_s3 + $0x10] sm:$0xf] %vm423_vm0, %v497_v36  ;;  %436 = vst.msk [vmem:[%s833_s3 + $0x30] sm:$0xf] %vm423_vm0, %v505_v37  ;;  %v348_v42 = vmax.f32 %v300_v38, 0.0  ;;  %v356_v43 = vmax.f32 %v332_v39, 0.0  ;;  %v545_v44 = vadd.f32 %v544_v40, %v543_v33  ;;  %v569_v45 = vadd.f32 %v568_v41, %v567_v35 }
  0xfe   :  { %v546_v46 = vpop.f32.mrf.mxu0  ;;  %v570_v47 = vpop.f32.mrf.mxu1 }
  0xff   :  { %v498_v48 = vpack.c.bf16 %v348_v42, %v348_v42  ;;  %v506_v49 = vpack.c.bf16 %v356_v43, %v356_v43  ;;  %v305_v50 = vadd.f32 %v545_v44, %v748_v34  ;;  %v337_v51 = vadd.f32 %v569_v45, %v748_v34 }
 0x100   :  { %v547_v52 = vpop.f32.mrf.mxu0  ;;  %v571_v53 = vpop.f32.mrf.mxu1 }
 0x101   :  { %429 = vst.msk [vmem:[%s833_s3 + $0x14] sm:$0xf] %vm423_vm0, %v498_v48  ;;  %437 = vst.msk [vmem:[%s833_s3 + $0x34] sm:$0xf] %vm423_vm0, %v506_v49  ;;  %v349_v54 = vmax.f32 %v305_v50, 0.0  ;;  %v357_v55 = vmax.f32 %v337_v51, 0.0  ;;  %v548_v56 = vadd.f32 %v547_v52, %v546_v46  ;;  %v572_v57 = vadd.f32 %v571_v53, %v570_v47 }
 0x103   :  { %v499_v58 = vpack.c.bf16 %v349_v54, %v349_v54  ;;  %v507_v59 = vpack.c.bf16 %v357_v55, %v357_v55  ;;  %v308_v60 = vadd.f32 %v548_v56, %v748_v34  ;;  %v340_v61 = vadd.f32 %v572_v57, %v748_v34 }
 0x105   :  { %430 = vst.msk [vmem:[%s833_s3 + $0x18] sm:$0xf] %vm423_vm0, %v499_v58  ;;  %438 = vst.msk [vmem:[%s833_s3 + $0x38] sm:$0xf] %vm423_vm0, %v507_v59  ;;  %v350_v62 = vmax.f32 %v308_v60, 0.0  ;;  %v358_v63 = vmax.f32 %v340_v61, 0.0 }
 0x107   :  { %v500_v0 = vpack.c.bf16 %v350_v62, %v350_v62  ;;  %v508_v1 = vpack.c.bf16 %v358_v63, %v358_v63 }
 0x109   :  { %431 = vst.msk [vmem:[%s833_s3 + $0x1c] sm:$0xf] %vm423_vm0, %v500_v0  ;;  %439 = vst.msk [vmem:[%s833_s3 + $0x3c] sm:$0xf] %vm423_vm0, %v508_v1 }

// kernel: soft_q_forward.5
= control target key start
LH: loop header
LB: loop body
LE: loop exit
PB: predicated region body
PF: predicated region fallthrough
CT: control target
= control target key end

     0   :  { %vm444_vm0 = vcmask 519168   ;;  %s810_s0 = inlined_call_operand.vmem [shape: bf16[18,512], index: 0, kind: input, shape index: {}]   ;;  %s811_s1 = inlined_call_operand.vmem [shape: bf16[512,64], index: 1, kind: input, shape index: {}]   ;;  %s812_s2 = inlined_call_operand.vmem [shape: f32[1,64], index: 2, kind: input, shape index: {}]   ;;  %s813_s3 = inlined_call_operand.vmem [shape: bf16[18,64], index: 3, kind: output, shape index: {}]  }
   0x1   :  { %v611_v0 = vld [vmem:[%s811_s1 + $0x78] sm:$0xff]   ;;  %v615_v4 = vld [vmem:[%s811_s1 + $0x70] sm:$0xff]   ;;  %v619_v8 = vld [vmem:[%s811_s1 + $0x68] sm:$0xff]  }
   0x2   :  { %v612_v1 = vld [vmem:[%s811_s1 + $0xf8] sm:$0xff]   ;;  %555 = vmatprep.subr.bf16.mxu0 %v611_v0  ;;  %v616_v5 = vld [vmem:[%s811_s1 + $0xf0] sm:$0xff]   ;;  %v620_v9 = vld [vmem:[%s811_s1 + $0xe8] sm:$0xff]  }
   0x3   :  { %v613_v2 = vld [vmem:[%s811_s1 + $0x38] sm:$0xff]   ;;  %583 = vmatprep.subr.bf16.mxu1 %v612_v1  ;;  %v617_v6 = vld [vmem:[%s811_s1 + $0x30] sm:$0xff]   ;;  %v621_v10 = vld [vmem:[%s811_s1 + $0x28] sm:$0xff]  }
   0x4   :  { %v614_v3 = vld [vmem:[%s811_s1 + $0xb8] sm:$0xff]   ;;  %556 = vmatpush3.bf16.msra.mxu0 %v613_v2  ;;  %v618_v7 = vld [vmem:[%s811_s1 + $0xb0] sm:$0xff]   ;;  %v622_v11 = vld [vmem:[%s811_s1 + $0xa8] sm:$0xff]  }
   0x5   :  { %584 = vmatpush3.bf16.msra.mxu1 %v614_v3  ;;  %557 = vmatprep.subr.bf16.mxu0 %v615_v4  ;;  %v623_v12 = vld [vmem:[%s811_s1 + $0x60] sm:$0xff]   ;;  %v627_v16 = vld [vmem:[%s811_s1 + $0x58] sm:$0xff]   ;;  %v631_v20 = vld [vmem:[%s811_s1 + $0x50] sm:$0xff]  }
   0x6   :  { %585 = vmatprep.subr.bf16.mxu1 %v616_v5  ;;  %v624_v13 = vld [vmem:[%s811_s1 + $0xe0] sm:$0xff]   ;;  %v628_v17 = vld [vmem:[%s811_s1 + $0xd8] sm:$0xff]   ;;  %v632_v21 = vld [vmem:[%s811_s1 + $0xd0] sm:$0xff]  }
   0x7   :  { %v625_v14 = vld [vmem:[%s811_s1 + $0x20] sm:$0xff]   ;;  %v629_v18 = vld [vmem:[%s811_s1 + $0x18] sm:$0xff]   ;;  %v633_v22 = vld [vmem:[%s811_s1 + $0x10] sm:$0xff]  }
   0x8   :  { %558 = vmatpush3.bf16.msra.mxu0 %v617_v6  ;;  %v626_v15 = vld [vmem:[%s811_s1 + $0xa0] sm:$0xff]   ;;  %v630_v19 = vld [vmem:[%s811_s1 + $0x98] sm:$0xff]   ;;  %v634_v23 = vld [vmem:[%s811_s1 + $0x90] sm:$0xff]  }
   0x9   :  { %586 = vmatpush3.bf16.msra.mxu1 %v618_v7  ;;  %559 = vmatprep.subr.bf16.mxu0 %v619_v8  ;;  %v635_v24 = vld [vmem:[%s811_s1 + $0x48] sm:$0xff]   ;;  %v639_v28 = vld [vmem:[%s811_s1 + $0x40] sm:$0xff]  }
   0xa   :  { %587 = vmatprep.subr.bf16.mxu1 %v620_v9  ;;  %v636_v25 = vld [vmem:[%s811_s1 + $0xc8] sm:$0xff]   ;;  %v640_v29 = vld [vmem:[%s811_s1 + $0xc0] sm:$0xff]  }
   0xb   :  { %v637_v26 = vld [vmem:[%s811_s1 + $0x8] sm:$0xff]   ;;  %v641_v30 = vld [vmem:[%s811_s1] sm:$0xff]  }
   0xc   :  { %560 = vmatpush3.bf16.msra.mxu0 %v621_v10  ;;  %v638_v27 = vld [vmem:[%s811_s1 + $0x88] sm:$0xff]   ;;  %v642_v31 = vld [vmem:[%s811_s1 + $0x80] sm:$0xff]  }
   0xd   :  { %588 = vmatpush3.bf16.msra.mxu1 %v622_v11  ;;  %561 = vmatprep.subr.bf16.mxu0 %v623_v12  ;;  %v643_v32 = vld [vmem:[%s810_s0] ss:$16 sps:$4 sm:$0xff]   ;;  %v645_v33 = vld [vmem:[%s810_s0 + $0x4] ss:$16 sps:$4 sm:$0xff]   ;;  %v646_v34 = vld [vmem:[%s810_s0 + $0x8] ss:$16 sps:$4 sm:$0xff]  }
   0xe   :  { %589 = vmatprep.subr.bf16.mxu1 %v624_v13  ;;  %v648_v35 = vld [vmem:[%s810_s0 + $0xc] ss:$16 sps:$4 sm:$0xff]   ;;  %358 = vmatprep.mubr.bf16.mxu0 %v645_v33  ;;  %v649_v36 = vld [vmem:[%s810_s0 + $0x24] ss:$16 sps:$4 sm:$0xff]   ;;  %v653_v38 = vld [vmem:[%s810_s0 + $0x20] ss:$16 sps:$4 sm:$0xff]  }
   0xf   :  { %407 = vmatprep.mubr.bf16.mxu1 %v648_v35  ;;  %v651_v37 = vld [vmem:[%s810_s0 + $0x2c] ss:$16 sps:$4 sm:$0xff]   ;;  %v654_v39 = vld [vmem:[%s810_s0 + $0x28] ss:$16 sps:$4 sm:$0xff]   ;;  %v506_v42 = vld [vmem:[%s812_s2] ss:$0 sm:$0xff] }
  0x10   :  { %562 = vmatpush3.bf16.msra.mxu0 %v625_v14 }
  0x11   :  { %590 = vmatpush3.bf16.msra.mxu1 %v626_v15  ;;  %563 = vmatprep.subr.bf16.mxu0 %v627_v16 }
  0x12   :  { %591 = vmatprep.subr.bf16.mxu1 %v628_v17 }
  0x14   :  { %564 = vmatpush3.bf16.msra.mxu0 %v629_v18 }
  0x15   :  { %592 = vmatpush3.bf16.msra.mxu1 %v630_v19  ;;  %565 = vmatprep.subr.bf16.mxu0 %v631_v20 }
  0x16   :  { %593 = vmatprep.subr.bf16.mxu1 %v632_v21 }
  0x18   :  { %566 = vmatpush3.bf16.msra.mxu0 %v633_v22 }
  0x19   :  { %594 = vmatpush3.bf16.msra.mxu1 %v634_v23  ;;  %567 = vmatprep.subr.bf16.mxu0 %v635_v24 }
  0x1a   :  { %595 = vmatprep.subr.bf16.mxu1 %v636_v25 }
  0x1c   :  { %568 = vmatpush3.bf16.msra.mxu0 %v637_v26 }
  0x1d   :  { %596 = vmatpush3.bf16.msra.mxu1 %v638_v27  ;;  %569 = vmatprep.subr.bf16.mxu0 %v639_v28 }
  0x1e   :  { %597 = vmatprep.subr.bf16.mxu1 %v640_v29 }
  0x20   :  { %570 = vmatpush3.bf16.msra.mxu0 %v641_v30 }
  0x21   :  { %598 = vmatpush3.bf16.msra.mxu1 %v642_v31 }
  0x23   :  { %359 = vmatmul.mubr.bf16.vlgmr.msra.gmra.mxu0 %v643_v32 }
  0x24   :  { %408 = vmatmul.mubr.bf16.vlgmr.msra.gmra.mxu1 %v646_v34  ;;  %366 = vmatprep.mubr.bf16.mxu0 %v649_v36 }
  0x25   :  { %415 = vmatprep.mubr.bf16.mxu1 %v651_v37 }
  0x2b   :  { %367 = vmatmul.mubr.bf16.gmra.mxu0 %v653_v38 }
  0x2c   :  { %416 = vmatmul.mubr.bf16.gmra.mxu1 %v654_v39 }
  0xe3   :  { %v571_v40 = vpop.f32.mrf.mxu0 }
  0xe4   :  { %v599_v41 = vpop.f32.mrf.mxu1 }
  0xe5   :  { %v572_v43 = vpop.f32.mrf.mxu0 }
  0xe6   :  { %v573_v44 = vadd.f32 %v572_v43, %v571_v40  ;;  %v600_v45 = vpop.f32.mrf.mxu1 }
  0xe7   :  { %v574_v46 = vpop.f32.mrf.mxu0  ;;  %v601_v48 = vadd.f32 %v600_v45, %v599_v41 }
  0xe8   :  { %v361_v47 = vadd.f32 %v573_v44, %v506_v42  ;;  %v602_v49 = vpop.f32.mrf.mxu1 }
  0xe9   :  { %v575_v50 = vpop.f32.mrf.mxu0 }
  0xea   :  { %v410_v51 = vadd.f32 %v601_v48, %v361_v47  ;;  %v576_v52 = vadd.f32 %v575_v50, %v574_v46  ;;  %v603_v53 = vpop.f32.mrf.mxu1 }
  0xeb   :  { %v577_v54 = vpop.f32.mrf.mxu0  ;;  %v604_v57 = vadd.f32 %v603_v53, %v602_v49 }
  0xec   :  { %v424_v55 = vmax.f32 %v410_v51, 0.0  ;;  %v364_v56 = vadd.f32 %v576_v52, %v506_v42  ;;  %v605_v58 = vpop.f32.mrf.mxu1 }
  0xed   :  { %v578_v59 = vpop.f32.mrf.mxu0 }
  0xee   :  { %v551_v60 = vpack.c.bf16 %v424_v55, %v424_v55  ;;  %v413_v61 = vadd.f32 %v604_v57, %v364_v56  ;;  %v579_v62 = vadd.f32 %v578_v59, %v577_v54  ;;  %v606_v63 = vpop.f32.mrf.mxu1 }
  0xef   :  { %v580_v0 = vpop.f32.mrf.mxu0  ;;  %v607_v3 = vadd.f32 %v606_v63, %v605_v58 }
  0xf0   :  { %445 = vst.msk [vmem:[#allocation2] sm:$0xf] %vm444_vm0, %v551_v60  ;;  %v425_v1 = vmax.f32 %v413_v61, 0.0  ;;  %v369_v2 = vadd.f32 %v579_v62, %v506_v42  ;;  %v608_v4 = vpop.f32.mrf.mxu1 }
  0xf1   :  { %v581_v5 = vpop.f32.mrf.mxu0 }
  0xf2   :  { %v552_v6 = vpack.c.bf16 %v425_v1, %v425_v1  ;;  %v418_v7 = vadd.f32 %v607_v3, %v369_v2  ;;  %v609_v8 = vpop.f32.mrf.mxu1 }
  0xf4   :  { %446 = vst.msk [vmem:[#allocation2 + $0x4] sm:$0xf] %vm444_vm0, %v552_v6  ;;  %v426_v9 = vmax.f32 %v418_v7, 0.0 }
  0xf6   :  { %v553_v10 = vpack.c.bf16 %v426_v9, %v426_v9 }
  0xf7   :  { %v467_v11 = vld [vmem:[#allocation2] sm:$0xf] }
  0xf8   :  { %468 = vst [vmem:[%s813_s3] sm:$0xf] %v467_v11  ;;  %447 = vst.msk [vmem:[#allocation2 + $0x8] sm:$0xf] %vm444_vm0, %v553_v10 }
  0xfb   :  { %v469_v12 = vld [vmem:[#allocation2 + $0x4] sm:$0xf] }
  0xfc   :  { %470 = vst [vmem:[%s813_s3 + $0x4] sm:$0xf] %v469_v12 }
  0xff   :  { %v471_v13 = vld [vmem:[#allocation2 + $0x8] sm:$0xf] }
 0x100   :  { %472 = vst [vmem:[%s813_s3 + $0x8] sm:$0xf] %v471_v13 }

// kernel: soft_q_forward.6
= control target key start
LH: loop header
LB: loop body
LE: loop exit
PB: predicated region body
PF: predicated region fallthrough
CT: control target
= control target key end

     0   :  { %v836_v31 = vmov 0.0   ;;  %v121_v32 = vlaneseq  ;;  %v837_v37 = vmov 1966171168   ;;  %vm838_vm0 = vmmov 0   ;;  %s1015_s0 = inlined_call_operand.vmem [shape: bf16[2,576], index: 0, kind: input, shape index: {}]   ;;  %s1016_s1 = inlined_call_operand.vmem [shape: bf16[576,64], index: 1, kind: input, shape index: {}]   ;;  %s1017_s2 = inlined_call_operand.vmem [shape: f32[1,64], index: 2, kind: input, shape index: {}]   ;;  %s1018_s3 = inlined_call_operand.vmem [shape: bf16[2,64], index: 3, kind: output, shape index: {}]  }
   0x1   :  { %v788_v0 = vld [vmem:[%s1016_s1 + $0x78] sm:$0xff]   ;;  %v792_v4 = vld [vmem:[%s1016_s1 + $0x70] sm:$0xff]   ;;  %v796_v8 = vld [vmem:[%s1016_s1 + $0x68] sm:$0xff]   ;;  %v119_v38 = vunpack.c.l.s4 %v837_v37  ;;  %vm447_vm1 = vcmask 523264   ;;  %vm635_vm2 = vcmask 516096  }
   0x2   :  { %v789_v1 = vld [vmem:[%s1016_s1 + $0x38] sm:$0xff]   ;;  %724 = vmatprep.subr.bf16.mxu0 %v788_v0  ;;  %v793_v5 = vld [vmem:[%s1016_s1 + $0x30] sm:$0xff]   ;;  %v797_v9 = vld [vmem:[%s1016_s1 + $0x28] sm:$0xff]   ;;  %v122_v34 = vshrl.u32 %v121_v32, 7 }
   0x3   :  { %v790_v2 = vld [vmem:[%s1016_s1 + $0xf8] sm:$0xff]   ;;  %725 = vmatpush3.bf16.msra.mxu0 %v789_v1  ;;  %v794_v6 = vld [vmem:[%s1016_s1 + $0xf0] sm:$0xff]   ;;  %v798_v10 = vld [vmem:[%s1016_s1 + $0xe8] sm:$0xff]   ;;  %v120_v39 = vunpack.c.0.s8 %v119_v38 }
   0x4   :  { %v791_v3 = vld [vmem:[%s1016_s1 + $0xb8] sm:$0xff]   ;;  %746 = vmatprep.subr.bf16.mxu1 %v790_v2  ;;  %726 = vmatprep.subr.bf16.mxu0 %v792_v4  ;;  %v795_v7 = vld [vmem:[%s1016_s1 + $0xb0] sm:$0xff]   ;;  %v799_v11 = vld [vmem:[%s1016_s1 + $0xa8] sm:$0xff]  }
   0x5   :  { %747 = vmatpush3.bf16.msra.mxu1 %v791_v3  ;;  %v800_v12 = vld [vmem:[%s1016_s1 + $0x60] sm:$0xff]   ;;  %v804_v16 = vld [vmem:[%s1016_s1 + $0x58] sm:$0xff]   ;;  %v808_v20 = vld [vmem:[%s1016_s1 + $0x50] sm:$0xff]   ;;  %v967_v42 = vsub.s32 %v120_v39, %v122_v34 }
   0x6   :  { %748 = vmatprep.subr.bf16.mxu1 %v794_v6  ;;  %v801_v13 = vld [vmem:[%s1016_s1 + $0x20] sm:$0xff]   ;;  %v805_v17 = vld [vmem:[%s1016_s1 + $0x18] sm:$0xff]   ;;  %v809_v21 = vld [vmem:[%s1016_s1 + $0x10] sm:$0xff]  }
   0x7   :  { %727 = vmatpush3.bf16.msra.mxu0 %v793_v5  ;;  %v802_v14 = vld [vmem:[%s1016_s1 + $0xe0] sm:$0xff]   ;;  %v806_v18 = vld [vmem:[%s1016_s1 + $0xd8] sm:$0xff]   ;;  %v810_v22 = vld [vmem:[%s1016_s1 + $0xd0] sm:$0xff]  }
   0x8   :  { %728 = vmatprep.subr.bf16.mxu0 %v796_v8  ;;  %v803_v15 = vld [vmem:[%s1016_s1 + $0xa0] sm:$0xff]   ;;  %v807_v19 = vld [vmem:[%s1016_s1 + $0x98] sm:$0xff]   ;;  %v811_v23 = vld [vmem:[%s1016_s1 + $0x90] sm:$0xff]  }
   0x9   :  { %749 = vmatpush3.bf16.msra.mxu1 %v795_v7  ;;  %v812_v24 = vld [vmem:[%s1016_s1 + $0x48] sm:$0xff]   ;;  %v816_v28 = vld [vmem:[%s1016_s1 + $0x40] sm:$0xff]   ;;  %v825_v40 = vld [vmem:[%s1015_s0 + $0x14] ss:$5 sps:$4 sm:$0xff]  }
   0xa   :  { %750 = vmatprep.subr.bf16.mxu1 %v798_v10  ;;  %v813_v25 = vld [vmem:[%s1016_s1 + $0x8] sm:$0xff]   ;;  %v817_v29 = vld [vmem:[%s1016_s1] sm:$0xff]   ;;  %v152_v45 = vrot.slane %v825_v40, %v967_v42  ;;  %v827_v57 = vld [vmem:[%s1015_s0 + $0x18] ss:$5 sps:$4 sm:$0x11]  }
   0xb   :  { %729 = vmatpush3.bf16.msra.mxu0 %v797_v9  ;;  %v814_v26 = vld [vmem:[%s1016_s1 + $0xc8] sm:$0xff]   ;;  %v818_v30 = vld [vmem:[%s1016_s1 + $0xc0] sm:$0xff]   ;;  %v832_v62 = vld [vmem:[%s1016_s1 + $0x118] sm:$0xff]   ;;  %v159_v2 = vrot.slane %v827_v57, %v967_v42 }
   0xc   :  { %730 = vmatprep.subr.bf16.mxu0 %v800_v12  ;;  %v815_v27 = vld [vmem:[%s1016_s1 + $0x88] sm:$0xff]   ;;  %v831_v33 = vld [vmem:[%s1016_s1 + $0x80] sm:$0xff]   ;;  %v833_v4 = vld [vmem:[%s1016_s1 + $0x110] sm:$0xff]  }
   0xd   :  { %751 = vmatpush3.bf16.msra.mxu1 %v799_v11  ;;  %v819_v35 = vld [vmem:[%s1015_s0] ss:$5 sps:$4 sm:$0xff]   ;;  %v822_v36 = vld [vmem:[%s1015_s0 + $0xa] ss:$5 sps:$4 sm:$0xff]  }
   0xe   :  { %752 = vmatprep.subr.bf16.mxu1 %v802_v14  ;;  %v828_v41 = vld [vmem:[%s1015_s0 + $0x1e] ss:$5 sps:$4 sm:$0xff]   ;;  %v124_v43 = vrot.slane %v819_v35, %v967_v42  ;;  %v138_v44 = vrot.slane %v822_v36, %v967_v42  ;;  %v824_v54 = vld [vmem:[%s1015_s0 + $0xe] ss:$5 sps:$4 sm:$0x11]  }
   0xf   :  { %731 = vmatpush3.bf16.msra.mxu0 %v801_v13  ;;  %v166_v46 = vrot.slane %v828_v41, %v967_v42  ;;  %v821_v53 = vld [vmem:[%s1015_s0 + $0x4] ss:$5 sps:$4 sm:$0x11]   ;;  %v830_v58 = vld [vmem:[%s1015_s0 + $0x22] ss:$5 sps:$4 sm:$0x11]   ;;  %v145_v1 = vrot.slane %v824_v54, %v967_v42 }
  0x10   :  { %732 = vmatprep.subr.bf16.mxu0 %v804_v16  ;;  %v175_v47 = vcombine.high %v124_v43, %v138_v44  ;;  %v174_v48 = vcombine.low %v124_v43, %v138_v44  ;;  %v131_v0 = vrot.slane %v821_v53, %v967_v42  ;;  %v173_v3 = vrot.slane %v830_v58, %v967_v42  ;;  %v834_v7 = vld [vmem:[%s1016_s1 + $0x108] sm:$0xff]   ;;  %v835_v10 = vld [vmem:[%s1016_s1 + $0x100] sm:$0xff]  }
  0x11   :  { %753 = vmatpush3.bf16.msra.mxu1 %v803_v15  ;;  %v178_v49 = vcombine.high %v152_v45, %v166_v46  ;;  %v177_v50 = vcombine.low %v152_v45, %v166_v46 }
  0x12   :  { %754 = vmatprep.subr.bf16.mxu1 %v806_v18  ;;  %v200_v51 = vrot.slane %v175_v47, %v967_v42  ;;  %v186_v52 = vrot.slane %v174_v48, %v967_v42  ;;  %v176_v5 = vcombine.low %v131_v0, %v145_v1  ;;  %v179_v6 = vcombine.low %v159_v2, %v173_v3 }
  0x13   :  { %733 = vmatpush3.bf16.msra.mxu0 %v805_v17  ;;  %v221_v55 = vrot.slane %v178_v49, %v967_v42  ;;  %v207_v56 = vrot.slane %v177_v50, %v967_v42 }
  0x14   :  { %734 = vmatprep.subr.bf16.mxu0 %v808_v20  ;;  %v193_v8 = vrot.slane %v176_v5, %v967_v42  ;;  %v214_v9 = vrot.slane %v179_v6, %v967_v42  ;;  %v685_v20 = vld [vmem:[%s1017_s2] ss:$0 sm:$0xff] }
  0x15   :  { %755 = vmatpush3.bf16.msra.mxu1 %v807_v19  ;;  %v225_v59 = vcombine.low %v200_v51, %v221_v55  ;;  %v222_v60 = vcombine.low %v186_v52, %v207_v56  ;;  %v226_v61 = vcombine.high %v200_v51, %v221_v55  ;;  %v223_v63 = vcombine.high %v186_v52, %v207_v56 }
  0x16   :  { %756 = vmatprep.subr.bf16.mxu1 %v810_v22  ;;  %v224_v11 = vcombine.low %v193_v8, %v214_v9 }
  0x17   :  { %735 = vmatpush3.bf16.msra.mxu0 %v809_v21  ;;  %483 = vmatprep.mubr.bf16.mxu0 %v225_v59 }
  0x18   :  { %736 = vmatprep.subr.bf16.mxu0 %v812_v24  ;;  %524 = vmatprep.mubr.bf16.mxu1 %v226_v61 }
  0x19   :  { %757 = vmatpush3.bf16.msra.mxu1 %v811_v23 }
  0x1a   :  { %758 = vmatprep.subr.bf16.mxu1 %v814_v26 }
  0x1b   :  { %737 = vmatpush3.bf16.msra.mxu0 %v813_v25 }
  0x1c   :  { %738 = vmatprep.subr.bf16.mxu0 %v816_v28 }
  0x1d   :  { %759 = vmatpush3.bf16.msra.mxu1 %v815_v27 }
  0x1e   :  { %760 = vmatprep.subr.bf16.mxu1 %v818_v30 }
  0x1f   :  { %739 = vmatpush3.bf16.msra.mxu0 %v817_v29 }
  0x20   :  { %773 = vmatprep.subr.bf16.mxu0 %v836_v31 }
  0x21   :  { %761 = vmatpush3.bf16.msra.mxu1 %v831_v33 }
  0x22   :  { %484 = vmatmul.mubr.bf16.vlgmr.msra.gmra.mxu0 %v222_v60 }
  0x23   :  { %774 = vmatpush3.bf16.msra.mxu0 %v832_v62  ;;  %781 = vmatprep.mubr.msk.bf16.mxu0 %vm838_vm0, %v836_v31 }
  0x24   :  { %525 = vmatmul.mubr.bf16.vlgmr.msra.gmra.mxu1 %v223_v63  ;;  %775 = vmatprep.subr.bf16.mxu0 %v836_v31 }
  0x27   :  { %776 = vmatpush3.bf16.msra.mxu0 %v833_v4 }
  0x28   :  { %777 = vmatprep.subr.bf16.mxu0 %v836_v31 }
  0x2b   :  { %778 = vmatpush3.bf16.msra.mxu0 %v834_v7 }
  0x2c   :  { %779 = vmatprep.subr.bf16.mxu0 %v836_v31 }
  0x2f   :  { %780 = vmatpush3.bf16.msra.mxu0 %v835_v10 }
  0x32   :  { %782 = vmatmul.mubr.msk.bf16.vlgmr.msra.gmra.mxu0 %vm447_vm1, %v224_v11 }
  0xe2   :  { %v740_v12 = vpop.f32.mrf.mxu0 }
  0xe4   :  { %v762_v13 = vpop.f32.mrf.mxu1  ;;  %v741_v14 = vpop.f32.mrf.mxu0 }
  0xe5   :  { %v742_v19 = vadd.f32 %v741_v14, %v740_v12 }
  0xe6   :  { %v743_v15 = vpop.f32.mrf.mxu0  ;;  %v763_v16 = vpop.f32.mrf.mxu1 }
  0xe7   :  { %v486_v23 = vadd.f32 %v742_v19, %v685_v20  ;;  %v764_v24 = vadd.f32 %v763_v16, %v762_v13 }
  0xe8   :  { %v744_v17 = vpop.f32.mrf.mxu0  ;;  %v765_v18 = vpop.f32.mrf.mxu1 }
  0xe9   :  { %v745_v21 = vadd.f32 %v744_v17, %v743_v15  ;;  %v527_v28 = vadd.f32 %v764_v24, %v486_v23 }
  0xea   :  { %v766_v22 = vpop.f32.mrf.mxu1 }
  0xeb   :  { %v489_v25 = vadd.f32 %v745_v21, %v685_v20  ;;  %v767_v26 = vadd.f32 %v766_v22, %v765_v18 }
  0xed   :  { %v530_v31 = vadd.f32 %v767_v26, %v489_v25 }
  0xf2   :  { %v567_v27 = vpop.f32.mrf.mxu0 }
  0xf3   :  { %v568_v30 = vadd.f32 %v567_v27, %v527_v28 }
  0xf4   :  { %v783_v29 = vpop.f32.mrf.mxu0 }
  0xf5   :  { %v574_v35 = vmax.f32 %v568_v30, 0.0 }
  0xf6   :  { %v570_v32 = vpop.f32.mrf.mxu0 }
  0xf7   :  { %v571_v33 = vadd.f32 %v570_v32, %v530_v31 }
  0xf8   :  { %v784_v34 = vpop.f32.mrf.mxu0 }
  0xf9   :  { %v575_v36 = vmax.f32 %v571_v33, 0.0 }
  0xfb   :  { %v576_v37 = vpack.c.bf16 %v575_v36, %v574_v35 }
  0xfd   :  { %v585_v38 = vrot.slane %v576_v37, %v967_v42 }
  0xff   :  { %v601_v39 = vrot.slane %v585_v38, %v967_v42 }
 0x101   :  { %636 = vst.msk [vmem:[#allocation2] sm:$0x1] %vm635_vm2, %v601_v39 }
 0x108   :  { %v662_v40 = vld [vmem:[#allocation2] sm:$0x1] }
 0x109   :  { %663 = vst [vmem:[%s1018_s3] sm:$0x1] %v662_v40 }

// kernel: soft_q_forward.7
= control target key start
LH: loop header
LB: loop body
LE: loop exit
PB: predicated region body
PF: predicated region fallthrough
CT: control target
= control target key end

     0   :  { %10 = vsyncpa [#allocation3], 0  ;;  %v849_v1 = vmov 0   ;;  %v48_v5 = vlaneseq  ;;  %v850_v6 = vmov 1966171168   ;;  %vm205_vm0 = vcmask 523264   ;;  %s1068_s0 = inlined_call_operand.vmem [shape: bf16[2,64], index: 0, kind: input, shape index: {}]   ;;  %s1069_s1 = inlined_call_operand.vmem [shape: bf16[64,512], index: 1, kind: input, shape index: {}]   ;;  %s1070_s2 = inlined_call_operand.vmem [shape: f32[1,512], index: 2, kind: input, shape index: {}]   ;;  %s1071_s3 = inlined_call_operand.vmem [shape: bf16[512,6], index: 3, kind: input, shape index: {}]   ;;  %s1072_s4 = inlined_call_operand.vmem [shape: f32[1,6], index: 4, kind: input, shape index: {}]   ;;  %s1073_s5 = inlined_call_operand.hbm [shape: f32[2,6], index: 5, kind: output, shape index: {}]  }
   0x1   :  { %v771_v0 = vld [vmem:[%s1069_s1 + $0x64] ss:$16 sps:$4 sm:$0xff]   ;;  %241 = vmatprep.mubr.bf16.mxu0 %v849_v1  ;;  %284 = vmatprep.mubr.bf16.mxu1 %v849_v1  ;;  %v773_v2 = vld [vmem:[%s1069_s1 + $0x6c] ss:$16 sps:$4 sm:$0xff]   ;;  %v775_v3 = vld [vmem:[%s1069_s1 + $0x60] ss:$16 sps:$4 sm:$0xff]   ;;  %v81_v7 = vunpack.c.l.s4 %v850_v6 }
   0x2   :  { %v776_v4 = vld [vmem:[%s1069_s1 + $0x68] ss:$16 sps:$4 sm:$0xff]   ;;  %217 = vmatprep.subr.bf16.mxu0 %v771_v0  ;;  %v777_v8 = vld [vmem:[%s1069_s1 + $0x44] ss:$16 sps:$4 sm:$0xff]   ;;  %260 = vmatprep.subr.bf16.mxu1 %v773_v2  ;;  %v779_v9 = vld [vmem:[%s1069_s1 + $0x4c] ss:$16 sps:$4 sm:$0xff]  }
   0x3   :  { %218 = vmatpush1.bf16.msra.mxu0 %v775_v3  ;;  %261 = vmatpush1.bf16.msra.mxu1 %v776_v4  ;;  %v781_v10 = vld [vmem:[%s1069_s1 + $0x40] ss:$16 sps:$4 sm:$0xff]   ;;  %v782_v11 = vld [vmem:[%s1069_s1 + $0x48] ss:$16 sps:$4 sm:$0xff]   ;;  %v783_v12 = vld [vmem:[%s1069_s1 + $0x24] ss:$16 sps:$4 sm:$0xff]   ;;  %v82_v14 = vunpack.c.0.s8 %v81_v7 }
   0x4   :  { %219 = vmatprep.subr.bf16.mxu0 %v777_v8  ;;  %262 = vmatprep.subr.bf16.mxu1 %v779_v9  ;;  %v911_v13 = vshrl.u32 %v48_v5, 7  ;;  %v785_v15 = vld [vmem:[%s1069_s1 + $0x2c] ss:$16 sps:$4 sm:$0xff]   ;;  %v787_v16 = vld [vmem:[%s1069_s1 + $0x20] ss:$16 sps:$4 sm:$0xff]   ;;  %vm652_vm1 = vcmask 48128  }
   0x5   :  { %v788_v17 = vld [vmem:[%s1069_s1 + $0x28] ss:$16 sps:$4 sm:$0xff]   ;;  %v789_v18 = vld [vmem:[%s1069_s1 + $0x4] ss:$16 sps:$4 sm:$0xff]   ;;  %v791_v19 = vld [vmem:[%s1069_s1 + $0xc] ss:$16 sps:$4 sm:$0xff]  }
   0x6   :  { %v793_v20 = vld [vmem:[%s1069_s1] ss:$16 sps:$4 sm:$0xff]   ;;  %v85_v21 = vsub.s32 %v82_v14, %v911_v13  ;;  %v794_v22 = vld [vmem:[%s1069_s1 + $0x8] ss:$16 sps:$4 sm:$0xff]   ;;  %v26_v27 = vld [vmem:[%s1068_s0 + $0x4] sm:$0x1] }
   0x7   :  { %220 = vmatpush1.bf16.msra.mxu0 %v781_v10  ;;  %263 = vmatpush1.bf16.msra.mxu1 %v782_v11  ;;  %v22_v23 = vld [vmem:[%s1068_s0] sm:$0x1]  ;;  %v23_v24 = vld [vmem:[%s1068_s0 + $0x1] sm:$0x1]  ;;  %v24_v25 = vld [vmem:[%s1068_s0 + $0x2] sm:$0x1] }
   0x8   :  { %221 = vmatprep.subr.bf16.mxu0 %v783_v12  ;;  %264 = vmatprep.subr.bf16.mxu1 %v785_v15  ;;  %v25_v26 = vld [vmem:[%s1068_s0 + $0x3] sm:$0x1]  ;;  %v27_v28 = vld [vmem:[%s1068_s0 + $0x5] sm:$0x1]  ;;  %v76_v29 = vcombine.low %v22_v23, %v23_v24  ;;  %v28_v30 = vld [vmem:[%s1068_s0 + $0x6] sm:$0x1] }
   0x9   :  { %v29_v31 = vld [vmem:[%s1068_s0 + $0x7] sm:$0x1]  ;;  %v77_v32 = vcombine.low %v24_v25, %v25_v26  ;;  %v78_v33 = vcombine.low %v26_v27, %v27_v28  ;;  %v795_v36 = vld [vmem:[%s1071_s3 + $0x78] sm:$0xff]   ;;  %v799_v47 = vld [vmem:[%s1071_s3 + $0x70] sm:$0xff]   ;;  %v54_v12 = vsub.s32 1, %v911_v13  ;;  %v62_v14 = vsub.s32 3, %v911_v13 }
   0xa   :  { %v79_v34 = vcombine.low %v28_v30, %v29_v31  ;;  %v86_v35 = vrot.slane %v76_v29, %v85_v21  ;;  %v796_v39 = vld [vmem:[%s1071_s3 + $0xf8] sm:$0xff]   ;;  %v800_v49 = vld [vmem:[%s1071_s3 + $0xf0] sm:$0xff]   ;;  %v803_v52 = vld [vmem:[%s1071_s3 + $0x68] sm:$0xff]   ;;  %v50_v15 = vsub.s32 0, %v911_v13 }
   0xb   :  { %222 = vmatpush1.bf16.msra.mxu0 %v787_v16  ;;  %265 = vmatpush1.bf16.msra.mxu1 %v788_v17  ;;  %v93_v37 = vrot.slane %v77_v32, %v85_v21  ;;  %v100_v38 = vrot.slane %v78_v33, %v85_v21  ;;  %v797_v44 = vld [vmem:[%s1071_s3 + $0x38] sm:$0xff]   ;;  %v801_v50 = vld [vmem:[%s1071_s3 + $0x30] sm:$0xff]   ;;  %v804_v53 = vld [vmem:[%s1071_s3 + $0xe8] sm:$0xff]   ;;  %v58_v16 = vsub.s32 2, %v911_v13 }
   0xc   :  { %223 = vmatprep.subr.bf16.mxu0 %v789_v18  ;;  %266 = vmatprep.subr.bf16.mxu1 %v791_v19  ;;  %v107_v40 = vrot.slane %v79_v34, %v85_v21  ;;  %v798_v46 = vld [vmem:[%s1071_s3 + $0xb8] sm:$0xff]   ;;  %v802_v51 = vld [vmem:[%s1071_s3 + $0xb0] sm:$0xff]   ;;  %v805_v54 = vld [vmem:[%s1071_s3 + $0x28] sm:$0xff]  }
   0xd   :  { %v108_v41 = vcombine.low %v86_v35, %v93_v37  ;;  %v806_v55 = vld [vmem:[%s1071_s3 + $0xa8] sm:$0xff]   ;;  %v807_v56 = vld [vmem:[%s1071_s3 + $0x60] sm:$0xff]   ;;  %v811_v60 = vld [vmem:[%s1071_s3 + $0x58] sm:$0xff]  }
   0xe   :  { %v109_v42 = vcombine.low %v100_v38, %v107_v40  ;;  %v808_v57 = vld [vmem:[%s1071_s3 + $0xe0] sm:$0xff]   ;;  %v812_v61 = vld [vmem:[%s1071_s3 + $0xd8] sm:$0xff]   ;;  %v815_v0 = vld [vmem:[%s1071_s3 + $0x50] sm:$0xff]  }
   0xf   :  { %224 = vmatpush1.bf16.msra.mxu0 %v793_v20  ;;  %267 = vmatpush1.bf16.msra.mxu1 %v794_v22  ;;  %v116_v43 = vrot.slane %v108_v41, %v85_v21  ;;  %v809_v58 = vld [vmem:[%s1071_s3 + $0x20] sm:$0xff]   ;;  %v813_v62 = vld [vmem:[%s1071_s3 + $0x18] sm:$0xff]   ;;  %v816_v1 = vld [vmem:[%s1071_s3 + $0xd0] sm:$0xff]  }
  0x10   :  { %722 = vmatprep.subr.bf16.mxu0 %v795_v36  ;;  %744 = vmatprep.subr.bf16.mxu1 %v796_v39  ;;  %v123_v45 = vrot.slane %v109_v42, %v85_v21  ;;  %v810_v59 = vld [vmem:[%s1071_s3 + $0xa0] sm:$0xff]   ;;  %v814_v63 = vld [vmem:[%s1071_s3 + $0x98] sm:$0xff]   ;;  %v817_v2 = vld [vmem:[%s1071_s3 + $0x10] sm:$0xff]  }
  0x11   :  { %v818_v3 = vld [vmem:[%s1071_s3 + $0x90] sm:$0xff]   ;;  %v819_v4 = vld [vmem:[%s1071_s3 + $0x48] sm:$0xff]   ;;  %v823_v8 = vld [vmem:[%s1071_s3 + $0x40] sm:$0xff]  }
  0x12   :  { %v124_v48 = vcombine.low %v116_v43, %v123_v45  ;;  %v820_v5 = vld [vmem:[%s1071_s3 + $0xc8] sm:$0xff]   ;;  %v824_v9 = vld [vmem:[%s1071_s3 + $0xc0] sm:$0xff]  }
  0x13   :  { %v821_v6 = vld [vmem:[%s1071_s3 + $0x8] sm:$0xff]   ;;  %v825_v10 = vld [vmem:[%s1071_s3] sm:$0xff]  }
  0x14   :  { %687 = vmatmul.mubr.msk.bf16.vlgmr.msra.gmra.mxu0 %vm205_vm0, %v124_v48  ;;  %688 = vmatmul.mubr.msk.bf16.vlgmr.msra.gmra.mxu1 %vm205_vm0, %v124_v48  ;;  %v822_v7 = vld [vmem:[%s1071_s3 + $0x88] sm:$0xff]   ;;  %v826_v11 = vld [vmem:[%s1071_s3 + $0x80] sm:$0xff]  }
  0x15   :  { %723 = vmatpush3.bf16.msra.mxu0 %v797_v44  ;;  %745 = vmatpush3.bf16.msra.mxu1 %v798_v46  ;;  %v46_v17 = vld [vmem:[%s1070_s2] sm:$0xf] }
  0x16   :  { %724 = vmatprep.subr.bf16.mxu0 %v799_v47  ;;  %746 = vmatprep.subr.bf16.mxu1 %v800_v49  ;;  %v55_v20 = vrot.slane %v46_v17, %v54_v12  ;;  %v63_v21 = vrot.slane %v46_v17, %v62_v14  ;;  %v51_v22 = vrot.slane %v46_v17, %v50_v15 }
  0x17   :  { %v59_v23 = vrot.slane %v46_v17, %v58_v16 }
  0x19   :  { %725 = vmatpush3.bf16.msra.mxu0 %v801_v50  ;;  %747 = vmatpush3.bf16.msra.mxu1 %v802_v51  ;;  %v689_v51 = vld [vmem:[%s1072_s4] ss:$0 sm:$0xff] }
  0x1a   :  { %726 = vmatprep.subr.bf16.mxu0 %v803_v52  ;;  %748 = vmatprep.subr.bf16.mxu1 %v804_v53 }
  0x1d   :  { %727 = vmatpush3.bf16.msra.mxu0 %v805_v54  ;;  %749 = vmatpush3.bf16.msra.mxu1 %v806_v55 }
  0x1e   :  { %728 = vmatprep.subr.bf16.mxu0 %v807_v56  ;;  %750 = vmatprep.subr.bf16.mxu1 %v808_v57 }
  0x21   :  { %729 = vmatpush3.bf16.msra.mxu0 %v809_v58  ;;  %751 = vmatpush3.bf16.msra.mxu1 %v810_v59 }
  0x22   :  { %730 = vmatprep.subr.bf16.mxu0 %v811_v60  ;;  %752 = vmatprep.subr.bf16.mxu1 %v812_v61 }
  0x25   :  { %731 = vmatpush3.bf16.msra.mxu0 %v813_v62  ;;  %753 = vmatpush3.bf16.msra.mxu1 %v814_v63 }
  0x26   :  { %732 = vmatprep.subr.bf16.mxu0 %v815_v0  ;;  %754 = vmatprep.subr.bf16.mxu1 %v816_v1 }
  0x29   :  { %733 = vmatpush3.bf16.msra.mxu0 %v817_v2  ;;  %755 = vmatpush3.bf16.msra.mxu1 %v818_v3 }
  0x2a   :  { %734 = vmatprep.subr.bf16.mxu0 %v819_v4  ;;  %756 = vmatprep.subr.bf16.mxu1 %v820_v5 }
  0x2d   :  { %735 = vmatpush3.bf16.msra.mxu0 %v821_v6  ;;  %757 = vmatpush3.bf16.msra.mxu1 %v822_v7 }
  0x2e   :  { %736 = vmatprep.subr.bf16.mxu0 %v823_v8  ;;  %758 = vmatprep.subr.bf16.mxu1 %v824_v9 }
  0x31   :  { %737 = vmatpush3.bf16.msra.mxu0 %v825_v10  ;;  %759 = vmatpush3.bf16.msra.mxu1 %v826_v11 }
  0xd4   :  { %v243_v18 = vpop.f32.mrf.mxu0  ;;  %v286_v19 = vpop.f32.mrf.mxu1 }
  0xd5   :  { %v244_v32 = vadd.f32 %v243_v18, %v51_v22  ;;  %v287_v13 = vadd.f32 %v286_v19, %v59_v23 }
  0xd6   :  { %v245_v24 = vpop.f32.mrf.mxu0  ;;  %v288_v25 = vpop.f32.mrf.mxu1 }
  0xd7   :  { %v246_v28 = vadd.f32 %v245_v24, %v55_v20  ;;  %v289_v29 = vadd.f32 %v288_v25, %v63_v21  ;;  %v295_v43 = vmax.f32 %v244_v32, 0.0  ;;  %v297_v44 = vmax.f32 %v287_v13, 0.0 }
  0xd8   :  { %v247_v26 = vpop.f32.mrf.mxu0  ;;  %v290_v27 = vpop.f32.mrf.mxu1 }
  0xd9   :  { %v248_v30 = vadd.f32 %v247_v26, %v51_v22  ;;  %v291_v31 = vadd.f32 %v290_v27, %v59_v23  ;;  %v296_v39 = vmax.f32 %v246_v28, 0.0  ;;  %v298_v40 = vmax.f32 %v289_v29, 0.0 }
  0xda   :  { %v249_v33 = vpop.f32.mrf.mxu0  ;;  %v292_v34 = vpop.f32.mrf.mxu1 }
  0xdb   :  { %v250_v35 = vadd.f32 %v249_v33, %v55_v20  ;;  %v293_v36 = vadd.f32 %v292_v34, %v63_v21  ;;  %v299_v37 = vmax.f32 %v248_v30, 0.0  ;;  %v301_v38 = vmax.f32 %v291_v31, 0.0 }
  0xdd   :  { %v300_v41 = vmax.f32 %v250_v35, 0.0  ;;  %v302_v42 = vmax.f32 %v293_v36, 0.0  ;;  %v303_v47 = vpack.c.bf16 %v299_v37, %v295_v43  ;;  %v305_v48 = vpack.c.bf16 %v301_v38, %v297_v44 }
  0xdf   :  { %v304_v45 = vpack.c.bf16 %v300_v41, %v296_v39  ;;  %v306_v46 = vpack.c.bf16 %v302_v42, %v298_v40 }
  0xe1   :  { %602 = vmatprep.mubr.bf16.mxu0 %v304_v45  ;;  %643 = vmatprep.mubr.bf16.mxu1 %v306_v46 }
  0xe2   :  { %603 = vmatmul.mubr.bf16.vlgmr.msra.gmra.mxu0 %v303_v47  ;;  %644 = vmatmul.mubr.bf16.vlgmr.msra.gmra.mxu1 %v305_v48 }
 0x1a2   :  { %v738_v49 = vpop.f32.mrf.mxu0  ;;  %v760_v50 = vpop.f32.mrf.mxu1 }
 0x1a4   :  { %v739_v52 = vpop.f32.mrf.mxu0  ;;  %v761_v53 = vpop.f32.mrf.mxu1 }
 0x1a5   :  { %v740_v54 = vadd.f32 %v739_v52, %v738_v49  ;;  %v762_v58 = vadd.f32 %v761_v53, %v760_v50 }
 0x1a6   :  { %v741_v55 = vpop.f32.mrf.mxu0  ;;  %v763_v56 = vpop.f32.mrf.mxu1 }
 0x1a7   :  { %v605_v57 = vadd.f32 %v740_v54, %v689_v51 }
 0x1a8   :  { %v742_v59 = vpop.f32.mrf.mxu0  ;;  %v764_v60 = vpop.f32.mrf.mxu1 }
 0x1a9   :  { %v646_v61 = vadd.f32 %v762_v58, %v605_v57  ;;  %v743_v62 = vadd.f32 %v742_v59, %v741_v55  ;;  %v765_v0 = vadd.f32 %v764_v60, %v763_v56 }
 0x1ab   :  { %653 = vst.msk [vmem:[#allocation2] sm:$0xff] %vm652_vm1, %v646_v61  ;;  %v608_v63 = vadd.f32 %v743_v62, %v689_v51 }
 0x1ad   :  { %v649_v1 = vadd.f32 %v765_v0, %v608_v63 }
 0x1af   :  { %654 = vst.msk [vmem:[#allocation2 + $0x8] sm:$0xff] %vm652_vm1, %v649_v1 }
 0x1b0   :  { %659 = vsyncadd [#allocation3], 224  ;;  %s851_s26 = smov [#allocation2]  }
 0x1b1   :  { %s660_s4 = sshll.u32 %s851_s26, 4  ;;  %s661_s4 = int_to_ptr.vmem [resolvable:$true] %s660_s4 }
 0x1b2   :  { %s827_s27 = scalar_lea.vmem %s661_s4, 32  ;;  %s831_s28 = scalar_lea.vmem %s661_s4, 256 }
 0x1b3   :  { %p828_p0 = scmp.ne.s32.totalorder %s661_s4, %s827_s27  ;;  %p832_p1 = scmp.lt.s32.totalorder %s661_s4, %s661_s4 }
 0x1b4   :  { %p833_p2 = scmp.lt.s32.totalorder %s831_s28, %s827_s27 }
 0x1b6   :  { %p834_p3 = por %p833_p2, %p832_p1 }
 0x1b8   :  { %p835_p4 = pnand %p834_p3, %p828_p0 }
 0x1ba   :  { %838 = shalt.err (!%p835_p4)
}
 0x1bb   :  { %s852_s29 = smov 32   ;;  %s853_s30 = smov 2  }
 0x1bc   :  { %666 = dma.vmem_to_hbm [thread:$0]  %s661_s4, 32, %s1073_s5, [#allocation3], %s852_s29, %s852_s29, %s853_s30  }
 0x1bd   :  { %847 = dma.done.wait [#allocation3], 256  }
 0x1be   :  { %848 = vsyncadd [#allocation3], 4294967040 }
 0x1bf   :  { %670 = vsyncpa [#allocation3], 1 }

</bundles_post_ra>
